<compile_context>
chip_gen: v5e
topology: v5e:2x2
jax: 0.10.0
libtpu: 0.0.40
codegen_flags: <defaults>
</compile_context>

<pallas_src>
import jax
import jax.numpy as jnp
from jax.experimental import pallas as pl
from jax.experimental.pallas import tpu as pltpu


def _round_up(x, m):
    return ((x + m - 1) // m) * m


def _pad_rows(a, rows):
    if rows == a.shape[0]:
        return a
    return jnp.pad(a, ((0, rows - a.shape[0]), (0, 0)))


# --------------------------------------------------------------------------
# Pallas kernels
# --------------------------------------------------------------------------
def _mlp_edge_kernel_concat(ee_ref, w1_ref, b1_ref, w2_ref, b2_ref, out_ref):
    # ee: (TE, 2D) bf16, w1: (2D, H) bf16 -> MXU, f32 accumulate.
    h = jnp.dot(ee_ref[...], w1_ref[...], preferred_element_type=jnp.float32)
    h = jnp.maximum(h + b1_ref[...], 0.0)                      # f32 epilogue (VPU)
    # Linear(H, 1) as VPU mul + lane reduction -> (TE, 1) output (no 128-wide pad)
    out_ref[...] = jnp.sum(h * w2_ref[...], axis=-1, keepdims=True) + b2_ref[...]


def _mlp_edge_kernel_split(src_ref, dst_ref, w1a_ref, w1b_ref, b1_ref,
                           w2_ref, b2_ref, out_ref):
    # split-weight form of cat([src, dst], 1) @ W1 (used when D >= 128)
    h = jnp.dot(src_ref[...], w1a_ref[...], preferred_element_type=jnp.float32)
    h = h + jnp.dot(dst_ref[...], w1b_ref[...],
                    preferred_element_type=jnp.float32)
    h = jnp.maximum(h + b1_ref[...], 0.0)
    out_ref[...] = jnp.sum(h * w2_ref[...], axis=-1, keepdims=True) + b2_ref[...]


def _att_edge_kernel(src_ref, dst_ref, out_ref):
    # edge_logits = sum(src * dst, axis=-1); bf16 reads, f32 math.
    s = src_ref[...].astype(jnp.float32)
    d = dst_ref[...].astype(jnp.float32)
    out_ref[...] = jnp.sum(s * d, axis=-1, keepdims=True)


# --------------------------------------------------------------------------
# Wrappers around pallas_call
# --------------------------------------------------------------------------
def mlp_edge_logits(emb_src, emb_dst, w1, b1, w2, b2, *, tile_e=1024):
    """emb_src/emb_dst: (E, D) f32; w1: (2D, H); b1: (H,); w2: (H, 1); b2: (1,)."""
    E, D = emb_src.shape
    H = w1.shape[1]

    te = min(tile_e, _round_up(E, 8))      # edge tile (rows), multiple of 8
    Ep = _round_up(E, te)                  # padded edge count
    grid = (Ep // te,)

    # bf16 MXU operands (halves the dominant HBM read traffic); epilogue f32.
    src = _pad_rows(emb_src, Ep).astype(jnp.bfloat16)
    dst = _pad_rows(emb_dst, Ep).astype(jnp.bfloat16)
    w1_bf = w1.astype(jnp.bfloat16)
    b1_r = b1.reshape(1, H).astype(jnp.float32)
    w2_r = w2[:, 0].reshape(1, H).astype(jnp.float32)
    b2_r = b2.reshape(1, 1).astype(jnp.float32)

    const = lambda shape: pl.BlockSpec(shape, lambda i: (0, 0))
    cparams = pltpu.CompilerParams(
        dimension_semantics=("parallel",),          # megacore sharding on v7x
        vmem_limit_bytes=32 * 1024 * 1024,
    )
    cost = pl.CostEstimate(
        flops=2 * Ep * (2 * D) * H + 3 * Ep * H,
        transcendentals=0,
        bytes_accessed=2 * Ep * D * 2 + 2 * D * H * 2 + (2 * H + 1) * 4 + Ep * 4,
    )

    if D < 128:
        # Small D: single K=2D matmul (better MXU/vreg utilization than 2x K=D).
        edge_emb = jnp.concatenate([src, dst], axis=1)          # (Ep, 2D) bf16
        out = pl.pallas_call(
            _mlp_edge_kernel_concat,
            out_shape=jax.ShapeDtypeStruct((Ep, 1), jnp.float32),
            grid=grid,
            in_specs=[pl.BlockSpec((te, 2 * D), lambda i: (i, 0)),
                      const((2 * D, H)), const((1, H)),
                      const((1, H)), const((1, 1))],
            out_specs=pl.BlockSpec((te, 1), lambda i: (i, 0)),
            compiler_params=cparams,
            cost_estimate=cost,
        )(edge_emb, w1_bf, b1_r, w2_r, b2_r)
    else:
        # D >= 128: split-weight form avoids materializing the concat in HBM.
        w1a, w1b = w1_bf[:D, :], w1_bf[D:, :]
        out = pl.pallas_call(
            _mlp_edge_kernel_split,
            out_shape=jax.ShapeDtypeStruct((Ep, 1), jnp.float32),
            grid=grid,
            in_specs=[pl.BlockSpec((te, D), lambda i: (i, 0)),
                      pl.BlockSpec((te, D), lambda i: (i, 0)),
                      const((D, H)), const((D, H)), const((1, H)),
                      const((1, H)), const((1, 1))],
            out_specs=pl.BlockSpec((te, 1), lambda i: (i, 0)),
            compiler_params=cparams,
            cost_estimate=cost,
        )(src, dst, w1a, w1b, b1_r, w2_r, b2_r)

    return out[:E, :]                      # (E, 1), matches torch output shape


def att_edge_logits(emb_src, emb_dst, *, tile_e=1024):
    """emb_src/emb_dst: (E, D) f32 -> (E,) f32."""
    E, D = emb_src.shape
    te = min(tile_e, _round_up(E, 8))
    Ep = _round_up(E, te)

    src = _pad_rows(emb_src, Ep).astype(jnp.bfloat16)
    dst = _pad_rows(emb_dst, Ep).astype(jnp.bfloat16)

    out = pl.pallas_call(
        _att_edge_kernel,
        out_shape=jax.ShapeDtypeStruct((Ep, 1), jnp.float32),
        grid=(Ep // te,),
        in_specs=[pl.BlockSpec((te, D), lambda i: (i, 0)),
                  pl.BlockSpec((te, D), lambda i: (i, 0))],
        out_specs=pl.BlockSpec((te, 1), lambda i: (i, 0)),
        compiler_params=pltpu.CompilerParams(
            dimension_semantics=("parallel",),
            vmem_limit_bytes=32 * 1024 * 1024),
        cost_estimate=pl.CostEstimate(
            flops=2 * Ep * D, transcendentals=0,
            bytes_accessed=2 * Ep * D * 2 + Ep * 4),
    )(src, dst)
    return out[:E, 0]                      # (E,), matches torch.sum(..., dim=-1)


# --------------------------------------------------------------------------
# Parameter init (xavier uniform weights, zero biases — matches init_emb)
# --------------------------------------------------------------------------
def xavier_uniform(key, shape):
    fan_in, fan_out = shape[0], shape[1]
    bound = (6.0 / (fan_in + fan_out)) ** 0.5
    return jax.random.uniform(key, shape, jnp.float32, -bound, bound)


def make_params(key, F, D, H):
    k_enc, k_w1, k_w2 = jax.random.split(key, 3)
    return {
        # synthetic encoder stand-in (Linear F->D, ReLU)
        "w_enc": xavier_uniform(k_enc, (F, D)),
        "b_enc": jnp.zeros((D,), jnp.float32),
        # mlp_edge_model = Linear(2D, H), ReLU, Linear(H, 1); biases zero
        "w1": xavier_uniform(k_w1, (2 * D, H)),
        "b1": jnp.zeros((H,), jnp.float32),
        "w2": xavier_uniform(k_w2, (H, 1)),
        "b2": jnp.zeros((1,), jnp.float32),
    }


def view_learner_forward(params, x, edge_index, type_learner, *, tile_e=1024):
    # ---- encoder (synthetic stand-in, glue) ----
    node_emb = jnp.maximum(x @ params["w_enc"] + params["b_enc"], 0.0)  # (N, D)

    # ---- gather per-edge embeddings (glue; see fusion TODO at top) ----
    src, dst = edge_index[0], edge_index[1]
    emb_src = jnp.take(node_emb, src, axis=0)                           # (E, D)
    emb_dst = jnp.take(node_emb, dst, axis=0)                           # (E, D)

    # ---- hot path in Pallas ----
    if type_learner in ("mlp", "gnn"):
        return mlp_edge_logits(emb_src, emb_dst,
                               params["w1"], params["b1"],
                               params["w2"], params["b2"],
                               tile_e=tile_e)                           # (E, 1)
    elif type_learner == "att":
        return att_edge_logits(emb_src, emb_dst, tile_e=tile_e)         # (E,)
    else:
        raise ValueError(type_learner)


# --------------------------------------------------------------------------
# Pure-JAX references
# --------------------------------------------------------------------------
def reference_forward(params, x, edge_index, type_learner, cast_bf16):
    node_emb = jnp.maximum(x @ params["w_enc"] + params["b_enc"], 0.0)
    es = node_emb[edge_index[0]]
    ed = node_emb[edge_index[1]]
    if type_learner in ("mlp", "gnn"):
        if cast_bf16:
            es, ed = es.astype(jnp.bfloat16), ed.astype(jnp.bfloat16)
            w1 = params["w1"].astype(jnp.bfloat16)
        else:
            w1 = params["w1"]
        ee = jnp.concatenate([es, ed], axis=1)
        h = jnp.maximum(jnp.dot(ee, w1, preferred_element_type=jnp.float32)
                        + params["b1"], 0.0)
        return (jnp.sum(h * params["w2"][:, 0][None, :], axis=-1, keepdims=True)
                + params["b2"].reshape(1, 1))
    else:
        if cast_bf16:
            es, ed = es.astype(jnp.bfloat16), ed.astype(jnp.bfloat16)
        return jnp.sum(es.astype(jnp.float32) * ed.astype(jnp.float32), axis=-1)


def _check_case(key, N, F, D, H, E, tile_e, tag):
    k_x, k_ei, k_p = jax.random.split(key, 3)
    x = jax.random.normal(k_x, (N, F), jnp.float32)
    edge_index = jax.random.randint(k_ei, (2, E), 0, N, dtype=jnp.int32)
    params = make_params(k_p, F, D, H)

    for tl in ("mlp", "att"):
        out = jax.block_until_ready(
            view_learner_forward(params, x, edge_index, tl, tile_e=tile_e))
        ref_bf = reference_forward(params, x, edge_index, tl, cast_bf16=True)
        ref_f32 = reference_forward(params, x, edge_index, tl, cast_bf16=False)
        expected_shape = (E, 1) if tl == "mlp" else (E,)
        assert out.shape == expected_shape, (tag, tl, out.shape)
        # tight check vs. bf16-cast reference (same math as kernel)
        assert jnp.allclose(out, ref_bf, atol=2e-3, rtol=2e-3), (tag, tl, "bf16 ref")
        # loose check vs. pure-f32 reference (module semantics)
        assert jnp.allclose(out, ref_f32, atol=1e-1, rtol=1e-1), (tag, tl, "f32 ref")


# --------------------------------------------------------------------------
# Main
# --------------------------------------------------------------------------
if __name__ == "__main__":
    key = jax.random.PRNGKey(0)
    k1, k2 = jax.random.split(key, 2)

    # scenario 1: small encoder dim (D=32 < 128 -> fused single K=2D matmul),
    # single edge tile
    _check_case(k1, N=16, F=32, D=32, H=64, E=32, tile_e=1024, tag="D32")

    # scenario 2: D=128 -> split-weight kernel; small tile_e so E=300 spans
    # multiple grid steps (grid=3) and exercises edge padding/masking
    _check_case(k2, N=16, F=32, D=128, H=64, E=300, tile_e=128, tag="D128")

    print("KERNEL_OK")
</pallas_src>

<mosaic_0001>
module attributes {stable_mosaic.version = 11 : i64} {
  func.func @_mlp_edge_kernel_concat(%arg0: i32, %arg1: memref<32x64xbf16, #tpu.memory_space<vmem>>, %arg2: memref<64x64xbf16, #tpu.memory_space<vmem>>, %arg3: memref<1x64xf32, #tpu.memory_space<vmem>>, %arg4: memref<1x64xf32, #tpu.memory_space<vmem>>, %arg5: memref<1x1xf32, #tpu.memory_space<vmem>>, %arg6: memref<32x1xf32, #tpu.memory_space<vmem>>) attributes {dimension_semantics = [#tpu.dimension_semantics<parallel>], iteration_bounds = array<i64: 1>, scalar_prefetch = 0 : i64, scratch_operands = 0 : i64, tpu.core_type = #tpu.core_type<tc>, window_params = [{transform_indices = @transform_0, window_bounds = array<i64: 32, 64>}, {pipeline_mode = #tpu.pipeline_mode<synchronous>, transform_indices = @transform_1, window_bounds = array<i64: 64, 64>}, {pipeline_mode = #tpu.pipeline_mode<synchronous>, transform_indices = @transform_2, window_bounds = array<i64: 1, 64>}, {pipeline_mode = #tpu.pipeline_mode<synchronous>, transform_indices = @transform_3, window_bounds = array<i64: 1, 64>}, {pipeline_mode = #tpu.pipeline_mode<synchronous>, transform_indices = @transform_4, window_bounds = array<i64: 1, 1>}, {transform_indices = @transform_5, window_bounds = array<i64: 32, 1>}]} {
    %c0 = arith.constant 0 : index
    %c0_0 = arith.constant 0 : index
    %0 = vector.load %arg1[%c0, %c0_0] : memref<32x64xbf16, #tpu.memory_space<vmem>>, vector<32x64xbf16>
    %c0_1 = arith.constant 0 : index
    %c0_2 = arith.constant 0 : index
    %1 = vector.load %arg2[%c0_1, %c0_2] : memref<64x64xbf16, #tpu.memory_space<vmem>>, vector<64x64xbf16>
    %cst = arith.constant dense<0.000000e+00> : vector<32x64xf32>
    %2 = tpu.matmul %0, %1, %cst {dimension_numbers = #tpu.dot_dimension_numbers<[1], [0], [0], [1], [0, 0, 1, 1], [], []>} : vector<32x64xbf16>, vector<64x64xbf16>, vector<32x64xf32> -> vector<32x64xf32>
    %c0_3 = arith.constant 0 : index
    %c0_4 = arith.constant 0 : index
    %3 = vector.load %arg3[%c0_3, %c0_4] : memref<1x64xf32, #tpu.memory_space<vmem>>, vector<1x64xf32>
    %4 = vector.broadcast %3 : vector<1x64xf32> to vector<32x64xf32>
    %5 = arith.addf %2, %4 : vector<32x64xf32>
    %cst_5 = arith.constant 0.000000e+00 : f32
    %6 = vector.broadcast %cst_5 : f32 to vector<32x64xf32>
    %7 = arith.maximumf %5, %6 : vector<32x64xf32>
    %c0_6 = arith.constant 0 : index
    %c0_7 = arith.constant 0 : index
    %8 = vector.load %arg4[%c0_6, %c0_7] : memref<1x64xf32, #tpu.memory_space<vmem>>, vector<1x64xf32>
    %9 = vector.broadcast %8 : vector<1x64xf32> to vector<32x64xf32>
    %10 = arith.mulf %7, %9 : vector<32x64xf32>
    %cst_8 = arith.constant dense<0.000000e+00> : vector<32xf32>
    %11 = vector.multi_reduction <add>, %10, %cst_8 [1] : vector<32x64xf32> to vector<32xf32>
    %12 = vector.shape_cast %11 : vector<32xf32> to vector<32x1xf32>
    %c0_9 = arith.constant 0 : index
    %c0_10 = arith.constant 0 : index
    %13 = vector.load %arg5[%c0_9, %c0_10] : memref<1x1xf32, #tpu.memory_space<vmem>>, vector<1x1xf32>
    %14 = vector.broadcast %13 : vector<1x1xf32> to vector<32x1xf32>
    %15 = arith.addf %12, %14 : vector<32x1xf32>
    %c0_11 = arith.constant 0 : index
    %c0_12 = arith.constant 0 : index
    %16 = vector.load %arg6[%c0_11, %c0_12] : memref<32x1xf32, #tpu.memory_space<vmem>>, vector<32x1xf32>
    tpu.vector_store %arg6[%c0_11, %c0_12], %15 {strides = array<i32>} : memref<32x1xf32, #tpu.memory_space<vmem>>, vector<32x1xf32>,
    return
  }
  func.func @transform_0(%arg0: i32) -> (i32, i32) {
    %c0_i32 = arith.constant 0 : i32
    %c0_i32_0 = arith.constant 0 : i32
    return %arg0, %c0_i32 : i32, i32
  }
  func.func @transform_1(%arg0: i32) -> (i32, i32) {
    %c0_i32 = arith.constant 0 : i32
    %c0_i32_0 = arith.constant 0 : i32
    %c0_i32_1 = arith.constant 0 : i32
    return %c0_i32, %c0_i32_0 : i32, i32
  }
  func.func @transform_2(%arg0: i32) -> (i32, i32) {
    %c0_i32 = arith.constant 0 : i32
    %c0_i32_0 = arith.constant 0 : i32
    %c0_i32_1 = arith.constant 0 : i32
    return %c0_i32, %c0_i32_0 : i32, i32
  }
  func.func @transform_3(%arg0: i32) -> (i32, i32) {
    %c0_i32 = arith.constant 0 : i32
    %c0_i32_0 = arith.constant 0 : i32
    %c0_i32_1 = arith.constant 0 : i32
    return %c0_i32, %c0_i32_0 : i32, i32
  }
  func.func @transform_4(%arg0: i32) -> (i32, i32) {
    %c0_i32 = arith.constant 0 : i32
    %c0_i32_0 = arith.constant 0 : i32
    %c0_i32_1 = arith.constant 0 : i32
    return %c0_i32, %c0_i32_0 : i32, i32
  }
  func.func @transform_5(%arg0: i32) -> (i32, i32) {
    %c0_i32 = arith.constant 0 : i32
    %c0_i32_0 = arith.constant 0 : i32
    return %arg0, %c0_i32 : i32, i32
  }
}

</mosaic_0001>

<bundles_post_ra>
// kernel: tpu_custom_call.1
= control target key start
LH: loop header
LB: loop body
LE: loop exit
PB: predicated region body
PF: predicated region fallthrough
CT: control target
= control target key end

     0   :  { %s336_s0 = inlined_call_operand.hbm [shape: bf16[32,64], index: 0, kind: input, shape index: {}]   ;;  %s337_s1 = inlined_call_operand.hbm [shape: bf16[64,64], index: 1, kind: input, shape index: {}]   ;;  %s338_s2 = inlined_call_operand.vmem [shape: f32[1,64], index: 2, kind: input, shape index: {}]   ;;  %s339_s3 = inlined_call_operand.vmem [shape: f32[1,64], index: 3, kind: input, shape index: {}]   ;;  %s340_s4 = inlined_call_operand.<no memory space> [shape: f32[1,1], index: 4, kind: input, shape index: {}]   ;;  %s341_s5 = inlined_call_operand.vmem [shape: f32[32,1], index: 5, kind: output, shape index: {}]  }
   0x1   :  { %v10_v0 = vstv %s340_s4 }
   0x2   :  { %11 = vst [vmem:[#allocation2] sm:$0x1] %v10_v0 }
   0x3   :  { %12 = vsyncpa [#allocation4], 0  ;;  %s18_s22 = sshll.u32 %s336_s0, 4  ;;  %s19_s22 = int_to_ptr.hbm [resolvable:$true] %s18_s22 }
   0x4   :  { %13 = vsyncpa [#allocation6], 0  ;;  %s269_s23 = smov [#allocation3]   ;;  %s31_s27 = sshll.u32 %s337_s1, 4  ;;  %s32_s27 = int_to_ptr.hbm [resolvable:$true] %s31_s27 }
   0x5   :  { %s20_s24 = sshll.u32 %s269_s23, 4  ;;  %s270_s28 = smov 64   ;;  %s21_s24 = int_to_ptr.vmem [resolvable:$true] %s20_s24 }
   0x6   :  { %s271_s29 = smov 4   ;;  %s272_s4 = smov [#allocation5]  }
   0x7   :  { %26 = dma.hbm_to_vmem [thread:$0]  %s19_s22, 256, %s21_s24, [#allocation4], %s270_s28, %s270_s28, %s271_s29  }
   0x8   :  { %s33_s30 = sshll.u32 %s272_s4, 4  ;;  %s34_s30 = int_to_ptr.vmem [resolvable:$true] %s33_s30 }
   0x9   :  { %39 = dma.hbm_to_vmem [thread:$0]  %s32_s27, 512, %s34_s30, [#allocation6], %s270_s28, %s270_s28, %s271_s29  }
   0xa   :  { %265 = dma.done.wait [#allocation4], 256  }
   0xb   :  { %266 = vsyncadd [#allocation4], 4294967040 }
   0xc   :  { %267 = dma.done.wait [#allocation6], 512  }
   0xd   :  { %268 = vsyncadd [#allocation6], 4294966784  ;;  %v205_v1 = vld [vmem:[#allocation5 + $0x18] sm:$0xff]  ;;  %v204_v2 = vld [vmem:[#allocation5 + $0x10] sm:$0xff]  ;;  %vm105_vm0 = vcmask 523264   ;;  %vm163_vm1 = vcmask 7168  }
   0xe   :  { %116 = vmatpush.bf16.msra.mxu0 %v205_v1  ;;  %206 = vmatpush.bf16.msra.mxu1 %v205_v1  ;;  %v203_v3 = vld [vmem:[#allocation5 + $0x8] sm:$0xff]  ;;  %v202_v4 = vld [vmem:[#allocation5] sm:$0xff]  ;;  %v200_v5 = vld [vmem:[#allocation3] sm:$0xff] }
   0xf   :  { %v201_v6 = vld [vmem:[#allocation3 + $0x8] sm:$0xff]  ;;  %v214_v7 = vld [vmem:[%s338_s2] ss:$0 sm:$0xff] }
  0x10   :  { %v215_v12 = vld [vmem:[%s339_s3] ss:$0 sm:$0xff] }
  0x11   :  { %v216_v29 = vld [vmem:[#allocation2] ss:$0 sm:$0xff] }
  0x12   :  { %117 = vmatpush.bf16.msra.mxu0 %v204_v2  ;;  %207 = vmatpush.bf16.msra.mxu1 %v204_v2 }
  0x16   :  { %118 = vmatpush.bf16.msra.mxu0 %v203_v3  ;;  %208 = vmatpush.bf16.msra.mxu1 %v203_v3 }
  0x1a   :  { %119 = vmatpush.bf16.msra.mxu0 %v202_v4  ;;  %209 = vmatpush.bf16.msra.mxu1 %v202_v4 }
  0x1d   :  { %198 = vmatmul.msk.bf16.vlgmr.msra.gmra.mxu0 %vm105_vm0, %v200_v5  ;;  %199 = vmatmul.msk.bf16.vlgmr.msra.gmra.mxu1 %vm105_vm0, %v201_v6 }
  0x9a   :  { %v121_v8 = vpop.f32.mrf.mxu0  ;;  %v126_v9 = vpop.f32.mrf.mxu1 }
  0x9b   :  { %v122_v10 = vadd.f32 %v214_v7, %v121_v8  ;;  %v127_v11 = vadd.f32 %v214_v7, %v126_v9 }
  0x9d   :  { %v131_v13 = vmax.f32 %v122_v10, 0.0  ;;  %v133_v14 = vmax.f32 %v127_v11, 0.0 }
  0x9f   :  { %v141_v15 = vmul.f32 %v215_v12, %v133_v14  ;;  %v139_v16 = vmul.f32 %v215_v12, %v131_v13 }
  0xa1   :  { %v149_v17 = vsel %vm105_vm0, %v141_v15, 0.0  ;;  %v143_v18 = vsel %vm105_vm0, %v139_v16, 0.0 }
  0xa2   :  { %v128_v19 = vpop.f32.mrf.mxu1  ;;  %150 = vadd.xlane.f32.xlu1 %v149_v17  ;;  %v123_v20 = vpop.f32.mrf.mxu0  ;;  %144 = vadd.xlane.f32.xlu0 %v143_v18 }
  0xa3   :  { %v129_v21 = vadd.f32 %v214_v7, %v128_v19  ;;  %v124_v22 = vadd.f32 %v214_v7, %v123_v20 }
  0xa5   :  { %v134_v23 = vmax.f32 %v129_v21, 0.0  ;;  %v132_v24 = vmax.f32 %v124_v22, 0.0 }
  0xa7   :  { %v142_v25 = vmul.f32 %v215_v12, %v134_v23  ;;  %v140_v26 = vmul.f32 %v215_v12, %v132_v24 }
  0xa9   :  { %v152_v27 = vsel %vm105_vm0, %v142_v25, 0.0  ;;  %v146_v28 = vsel %vm105_vm0, %v140_v26, 0.0 }
  0xaa   :  { %153 = vadd.xlane.f32.xlu1 %v152_v27  ;;  %147 = vadd.xlane.f32.xlu0 %v146_v28 }
 0x115   :  { %v151_v30 = vpop.xlane.xlu1 %150  ;;  %v145_v31 = vpop.xlane.xlu0 %144 }
 0x116   :  { %v161_v32 = vadd.f32 %v216_v29, %v151_v30  ;;  %v159_v33 = vadd.f32 %v216_v29, %v145_v31 }
 0x118   :  { %166 = vst.msk [vmem:[%s341_s5 + $0x10] sm:$0xff] %vm163_vm1, %v161_v32 }
 0x119   :  { %164 = vst.msk [vmem:[%s341_s5] sm:$0xff] %vm163_vm1, %v159_v33 }
 0x11d   :  { %v154_v34 = vpop.xlane.xlu1 %153  ;;  %v148_v35 = vpop.xlane.xlu0 %147 }
 0x11e   :  { %v162_v36 = vadd.f32 %v216_v29, %v154_v34  ;;  %v160_v37 = vadd.f32 %v216_v29, %v148_v35 }
 0x120   :  { %167 = vst.msk [vmem:[%s341_s5 + $0x18] sm:$0xff] %vm163_vm1, %v162_v36 }
 0x121   :  { %165 = vst.msk [vmem:[%s341_s5 + $0x8] sm:$0xff] %vm163_vm1, %v160_v37 }
 0x122   :  { %172 = vsyncpa [#allocation4], 1 }
 0x123   :  { %173 = vsyncpa [#allocation6], 1 }

</bundles_post_ra>
